<compile_context>
chip_gen: v7x
topology: tpu7x:2x2x1
jax: 0.10.0
libtpu: 0.0.40
codegen_flags: <defaults>
</compile_context>

<pallas_src>
import functools

import jax
import jax.numpy as jnp
import numpy as np
from jax import lax
from jax.experimental import pallas as pl
from jax.experimental.pallas import tpu as pltpu


def _round_up(x, m):
    return (x + m - 1) // m * m


def _depth_block_kernel(x_ref, wdw_ref, b1_ref, wpw_ref, b2_ref, o_ref, *,
                        KH, KW, TH, W):
    # x_ref  : (1, TH + 2*ph, Wp, Cp_in)  padded input row-tile (with halo), f32
    # wdw_ref: (KH*KW, Cp_in)   depthwise taps with BN1 scale folded in, f32
    # b1_ref : (1, Cp_in)       folded BN1 bias, f32
    # wpw_ref: (Cp_in, Cp_out)  pointwise weights with BN2 scale folded, bf16
    # b2_ref : (1, Cp_out)      folded BN2 bias, f32
    # o_ref  : (1, TH*W, Cp_out) lane-dense output (Cp_out % 128 == 0)
    Cp_in = x_ref.shape[-1]

    # --- depthwise conv: accumulate KH*KW shifted windows (f32, VPU) --------
    # Each window is loaded directly from the ref (static slices -> plain
    # vlds; no materialized-value copies) so loads overlap the FMAs.
    acc = x_ref[0, 0:TH, 0:W, :] * wdw_ref[0:1, :].reshape(1, 1, Cp_in)
    for kh in range(KH):
        for kw in range(KW):
            k = kh * KW + kw
            if k == 0:
                continue
            win = x_ref[0, kh:kh + TH, kw:kw + W, :]           # (TH, W, Cp_in)
            tap = wdw_ref[k:k + 1, :].reshape(1, 1, Cp_in)
            acc = acc + win * tap

    # --- folded BN1 bias + ReLU; flatten spatial into the MXU M dim ---------
    h = jnp.maximum(acc.reshape(TH * W, Cp_in) + b1_ref[...], 0.0)

    # --- pointwise 1x1 conv == channel matmul: bf16 in, f32 accumulation ----
    y = jnp.dot(h.astype(jnp.bfloat16), wpw_ref[...],
                preferred_element_type=jnp.float32)            # (TH*W, Cp_out)

    # --- folded BN2 bias + ReLU; lane-dense store ----------------------------
    o_ref[0] = jnp.maximum(y + b2_ref[...], 0.0).astype(o_ref.dtype)


def _pick_row_tile(H, W, Wp, Cp_in, Cp_out, ph, budget_bytes=4 << 20):
    """Largest divisor of H whose per-step blocks fit the budget, preferring a
    tile that yields >=2 grid steps (pipeline depth / megacore sharding)."""
    divs = [d for d in range(1, H + 1) if H % d == 0]

    def step_bytes(th):
        # f32 input tile (with halo) + f32 output tile; BlockSpec double-
        # buffers these, which is accounted for in the vmem_limit below.
        return 4 * ((th + 2 * ph) * Wp * Cp_in + th * W * Cp_out)

    fits = [d for d in divs if step_bytes(d) <= budget_bytes] or [1]
    multi = [d for d in fits if H // d >= 2]
    return max(multi) if multi else max(fits)


def depth_block_pallas(x_nchw, w_dw, bn1, w_pw, bn2, kernel=(3, 3), eps=1e-5):
    """x_nchw: (N, Cin, H, W) f32; w_dw: (Cin,1,KH,KW); w_pw: (Cout,Cin,1,1);
       bn1/bn2: (gamma, beta, running_mean, running_var). Returns NCHW f32."""
    KH, KW = kernel
    assert KH % 2 == 1 and KW % 2 == 1, "odd kernel sizes only (pad = k//2)"
    ph, pw = KH // 2, KW // 2
    N, Cin, H, W = x_nchw.shape
    Cout = w_pw.shape[0]

    Cp_in = _round_up(Cin, 128)
    Cp_out = _round_up(Cout, 128)
    Wp = W + 2 * pw

    # ---- wrapper glue (plain JAX): BN folding, layout, padding, tiling -----
    def fold(gamma, beta, mean, var):
        s = gamma / jnp.sqrt(var + eps)
        return s, beta - mean * s

    s1, b1 = fold(*bn1)
    s2, b2 = fold(*bn2)

    # Depthwise taps (KH*KW, Cin) with BN1 scale folded in; padded lanes = 0.
    wdw = jnp.transpose(w_dw[:, 0, :, :], (1, 2, 0)).reshape(KH * KW, Cin)
    wdw = jnp.pad(wdw * s1[None, :], ((0, 0), (0, Cp_in - Cin)))
    # Pointwise weights (Cin, Cout); BN2 scale folded into columns; bf16 MXU.
    wpw = jnp.transpose(w_pw[:, :, 0, 0], (1, 0)) * s2[None, :]
    wpw = jnp.pad(wpw, ((0, Cp_in - Cin), (0, Cp_out - Cout))).astype(jnp.bfloat16)
    b1p = jnp.pad(b1, (0, Cp_in - Cin)).reshape(1, Cp_in)
    b2p = jnp.pad(b2, (0, Cp_out - Cout)).reshape(1, Cp_out)

    # NHWC, zero halo in H/W, zero channel padding.
    x = jnp.transpose(x_nchw, (0, 2, 3, 1))
    x = jnp.pad(x, ((0, 0), (ph, ph), (pw, pw), (0, Cp_in - Cin)))

    TH = _pick_row_tile(H, W, Wp, Cp_in, Cp_out, ph)
    T = H // TH
    # Overlapping row tiles: duplicate the (2*ph)-row halo wrapper-side so the
    # kernel gets non-overlapping, rectangular, bounded VMEM blocks.
    x_tiles = jnp.stack(
        [x[:, t * TH:t * TH + TH + 2 * ph] for t in range(T)], axis=1)
    x_tiles = x_tiles.reshape(N * T, TH + 2 * ph, Wp, Cp_in)

    kernel_fn = functools.partial(_depth_block_kernel, KH=KH, KW=KW, TH=TH, W=W)

    out = pl.pallas_call(
        kernel_fn,
        out_shape=jax.ShapeDtypeStruct((N * T, TH * W, Cp_out), jnp.float32),
        grid_spec=pltpu.PrefetchScalarGridSpec(
            num_scalar_prefetch=0,
            grid=(N * T,),
            in_specs=[
                pl.BlockSpec((1, TH + 2 * ph, Wp, Cp_in),
                             lambda g: (g, 0, 0, 0)),
                # Weights / biases: constant block index -> fetched once and
                # kept resident across the grid.
                pl.BlockSpec((KH * KW, Cp_in), lambda g: (0, 0)),
                pl.BlockSpec((1, Cp_in), lambda g: (0, 0)),
                pl.BlockSpec((Cp_in, Cp_out), lambda g: (0, 0)),
                pl.BlockSpec((1, Cp_out), lambda g: (0, 0)),
            ],
            out_specs=pl.BlockSpec((1, TH * W, Cp_out), lambda g: (g, 0, 0)),
        ),
        compiler_params=pltpu.CompilerParams(
            dimension_semantics=("parallel",),
            vmem_limit_bytes=32 * 1024 * 1024),
    )(x_tiles, wdw, b1p, wpw, b2p)

    out = out.reshape(N, T, TH, W, Cp_out)[..., :Cout].reshape(N, H, W, Cout)
    return jnp.transpose(out, (0, 3, 1, 2))                    # back to NCHW


def _reference(x_nchw, w_dw, bn1, w_pw, bn2, kernel=(3, 3), eps=1e-5):
    KH, KW = kernel
    Cin = x_nchw.shape[1]

    def bn(x, params):
        g, b, m, v = params
        sh = (1, -1, 1, 1)
        return (x - m.reshape(sh)) / jnp.sqrt(v.reshape(sh) + eps) * g.reshape(sh) + b.reshape(sh)

    y = lax.conv_general_dilated(
        x_nchw, w_dw, window_strides=(1, 1),
        padding=((KH // 2, KH // 2), (KW // 2, KW // 2)),
        dimension_numbers=("NCHW", "OIHW", "NCHW"),
        feature_group_count=Cin)
    y = jnp.maximum(bn(y, bn1), 0.0)
    y = lax.conv_general_dilated(
        y, w_pw, window_strides=(1, 1), padding="VALID",
        dimension_numbers=("NCHW", "OIHW", "NCHW"))
    return jnp.maximum(bn(y, bn2), 0.0)


if __name__ == "__main__":
    key = jax.random.PRNGKey(0)
    N, Cin, Cout, H, W = 2, 8, 16, 16, 16
    KH, KW = 3, 3

    ks = jax.random.split(key, 9)
    x = jax.random.normal(ks[0], (N, Cin, H, W), jnp.float32)
    w_dw = jax.random.normal(ks[1], (Cin, 1, KH, KW), jnp.float32) * 0.2
    w_pw = jax.random.normal(ks[2], (Cout, Cin, 1, 1), jnp.float32) * 0.2
    bn1 = (1.0 + 0.1 * jax.random.normal(ks[3], (Cin,), jnp.float32),
           0.1 * jax.random.normal(ks[4], (Cin,), jnp.float32),
           0.1 * jax.random.normal(ks[5], (Cin,), jnp.float32),
           jnp.abs(jax.random.normal(ks[6], (Cin,), jnp.float32)) + 0.5)
    bn2 = (1.0 + 0.1 * jax.random.normal(ks[7], (Cout,), jnp.float32),
           0.1 * jax.random.normal(ks[8], (Cout,), jnp.float32),
           jnp.zeros((Cout,), jnp.float32),
           jnp.ones((Cout,), jnp.float32))

    out = depth_block_pallas(x, w_dw, bn1, w_pw, bn2, kernel=(KH, KW))
    out = jax.block_until_ready(out)

    ref = jax.block_until_ready(_reference(x, w_dw, bn1, w_pw, bn2, kernel=(KH, KW)))
    # bf16 on the MXU for the pointwise stage -> loosened tolerance.
    np.testing.assert_allclose(np.asarray(out), np.asarray(ref), rtol=2e-2, atol=2e-2)

    print("KERNEL_OK")
</pallas_src>

<mosaic_0001>
module attributes {stable_mosaic.version = 11 : i64} {
  func.func @_depth_block_kernel(%arg0: i32, %arg1: memref<1x10x18x128xf32, #tpu.memory_space<vmem>>, %arg2: memref<9x128xf32, #tpu.memory_space<vmem>>, %arg3: memref<1x128xf32, #tpu.memory_space<vmem>>, %arg4: memref<128x128xbf16, #tpu.memory_space<vmem>>, %arg5: memref<1x128xf32, #tpu.memory_space<vmem>>, %arg6: memref<1x128x128xf32, #tpu.memory_space<vmem>>) attributes {dimension_semantics = [#tpu.dimension_semantics<parallel>], iteration_bounds = array<i64: 4>, scalar_prefetch = 0 : i64, scratch_operands = 0 : i64, tpu.core_type = #tpu.core_type<tc>, window_params = [{transform_indices = @transform_0, window_bounds = array<i64: 1, 10, 18, 128>}, {pipeline_mode = #tpu.pipeline_mode<synchronous>, transform_indices = @transform_1, window_bounds = array<i64: 9, 128>}, {pipeline_mode = #tpu.pipeline_mode<synchronous>, transform_indices = @transform_2, window_bounds = array<i64: 1, 128>}, {pipeline_mode = #tpu.pipeline_mode<synchronous>, transform_indices = @transform_3, window_bounds = array<i64: 128, 128>}, {pipeline_mode = #tpu.pipeline_mode<synchronous>, transform_indices = @transform_4, window_bounds = array<i64: 1, 128>}, {transform_indices = @transform_5, window_bounds = array<i64: 1, 128, 128>}]} {
    %c0 = arith.constant 0 : index
    %c0_0 = arith.constant 0 : index
    %c0_1 = arith.constant 0 : index
    %c0_2 = arith.constant 0 : index
    %0 = vector.load %arg1[%c0, %c0_0, %c0_1, %c0_2] : memref<1x10x18x128xf32, #tpu.memory_space<vmem>>, vector<1x8x16x128xf32>
    %1 = vector.shape_cast %0 : vector<1x8x16x128xf32> to vector<8x16x128xf32>
    %c0_3 = arith.constant 0 : index
    %c0_4 = arith.constant 0 : index
    %2 = vector.load %arg2[%c0_3, %c0_4] : memref<9x128xf32, #tpu.memory_space<vmem>>, vector<1x128xf32>
    %3 = vector.shape_cast %2 : vector<1x128xf32> to vector<1x1x128xf32>
    %4 = vector.broadcast %3 : vector<1x1x128xf32> to vector<8x16x128xf32>
    %5 = arith.mulf %1, %4 : vector<8x16x128xf32>
    %c0_5 = arith.constant 0 : index
    %c0_6 = arith.constant 0 : index
    %c1 = arith.constant 1 : index
    %c0_7 = arith.constant 0 : index
    %6 = vector.load %arg1[%c0_5, %c0_6, %c1, %c0_7] : memref<1x10x18x128xf32, #tpu.memory_space<vmem>>, vector<1x8x16x128xf32>
    %7 = vector.shape_cast %6 : vector<1x8x16x128xf32> to vector<8x16x128xf32>
    %c1_8 = arith.constant 1 : index
    %c0_9 = arith.constant 0 : index
    %8 = vector.load %arg2[%c1_8, %c0_9] : memref<9x128xf32, #tpu.memory_space<vmem>>, vector<1x128xf32>
    %9 = vector.shape_cast %8 : vector<1x128xf32> to vector<1x1x128xf32>
    %10 = vector.broadcast %9 : vector<1x1x128xf32> to vector<8x16x128xf32>
    %11 = arith.mulf %7, %10 : vector<8x16x128xf32>
    %12 = arith.addf %5, %11 : vector<8x16x128xf32>
    %c0_10 = arith.constant 0 : index
    %c0_11 = arith.constant 0 : index
    %c2 = arith.constant 2 : index
    %c0_12 = arith.constant 0 : index
    %13 = vector.load %arg1[%c0_10, %c0_11, %c2, %c0_12] : memref<1x10x18x128xf32, #tpu.memory_space<vmem>>, vector<1x8x16x128xf32>
    %14 = vector.shape_cast %13 : vector<1x8x16x128xf32> to vector<8x16x128xf32>
    %c2_13 = arith.constant 2 : index
    %c0_14 = arith.constant 0 : index
    %15 = vector.load %arg2[%c2_13, %c0_14] : memref<9x128xf32, #tpu.memory_space<vmem>>, vector<1x128xf32>
    %16 = vector.shape_cast %15 : vector<1x128xf32> to vector<1x1x128xf32>
    %17 = vector.broadcast %16 : vector<1x1x128xf32> to vector<8x16x128xf32>
    %18 = arith.mulf %14, %17 : vector<8x16x128xf32>
    %19 = arith.addf %12, %18 : vector<8x16x128xf32>
    %c0_15 = arith.constant 0 : index
    %c1_16 = arith.constant 1 : index
    %c0_17 = arith.constant 0 : index
    %c0_18 = arith.constant 0 : index
    %20 = vector.load %arg1[%c0_15, %c1_16, %c0_17, %c0_18] : memref<1x10x18x128xf32, #tpu.memory_space<vmem>>, vector<1x8x16x128xf32>
    %21 = vector.shape_cast %20 : vector<1x8x16x128xf32> to vector<8x16x128xf32>
    %c3 = arith.constant 3 : index
    %c0_19 = arith.constant 0 : index
    %22 = vector.load %arg2[%c3, %c0_19] : memref<9x128xf32, #tpu.memory_space<vmem>>, vector<1x128xf32>
    %23 = vector.shape_cast %22 : vector<1x128xf32> to vector<1x1x128xf32>
    %24 = vector.broadcast %23 : vector<1x1x128xf32> to vector<8x16x128xf32>
    %25 = arith.mulf %21, %24 : vector<8x16x128xf32>
    %26 = arith.addf %19, %25 : vector<8x16x128xf32>
    %c0_20 = arith.constant 0 : index
    %c1_21 = arith.constant 1 : index
    %c1_22 = arith.constant 1 : index
    %c0_23 = arith.constant 0 : index
    %27 = vector.load %arg1[%c0_20, %c1_21, %c1_22, %c0_23] : memref<1x10x18x128xf32, #tpu.memory_space<vmem>>, vector<1x8x16x128xf32>
    %28 = vector.shape_cast %27 : vector<1x8x16x128xf32> to vector<8x16x128xf32>
    %c4 = arith.constant 4 : index
    %c0_24 = arith.constant 0 : index
    %29 = vector.load %arg2[%c4, %c0_24] : memref<9x128xf32, #tpu.memory_space<vmem>>, vector<1x128xf32>
    %30 = vector.shape_cast %29 : vector<1x128xf32> to vector<1x1x128xf32>
    %31 = vector.broadcast %30 : vector<1x1x128xf32> to vector<8x16x128xf32>
    %32 = arith.mulf %28, %31 : vector<8x16x128xf32>
    %33 = arith.addf %26, %32 : vector<8x16x128xf32>
    %c0_25 = arith.constant 0 : index
    %c1_26 = arith.constant 1 : index
    %c2_27 = arith.constant 2 : index
    %c0_28 = arith.constant 0 : index
    %34 = vector.load %arg1[%c0_25, %c1_26, %c2_27, %c0_28] : memref<1x10x18x128xf32, #tpu.memory_space<vmem>>, vector<1x8x16x128xf32>
    %35 = vector.shape_cast %34 : vector<1x8x16x128xf32> to vector<8x16x128xf32>
    %c5 = arith.constant 5 : index
    %c0_29 = arith.constant 0 : index
    %36 = vector.load %arg2[%c5, %c0_29] : memref<9x128xf32, #tpu.memory_space<vmem>>, vector<1x128xf32>
    %37 = vector.shape_cast %36 : vector<1x128xf32> to vector<1x1x128xf32>
    %38 = vector.broadcast %37 : vector<1x1x128xf32> to vector<8x16x128xf32>
    %39 = arith.mulf %35, %38 : vector<8x16x128xf32>
    %40 = arith.addf %33, %39 : vector<8x16x128xf32>
    %c0_30 = arith.constant 0 : index
    %c2_31 = arith.constant 2 : index
    %c0_32 = arith.constant 0 : index
    %c0_33 = arith.constant 0 : index
    %41 = vector.load %arg1[%c0_30, %c2_31, %c0_32, %c0_33] : memref<1x10x18x128xf32, #tpu.memory_space<vmem>>, vector<1x8x16x128xf32>
    %42 = vector.shape_cast %41 : vector<1x8x16x128xf32> to vector<8x16x128xf32>
    %c6 = arith.constant 6 : index
    %c0_34 = arith.constant 0 : index
    %43 = vector.load %arg2[%c6, %c0_34] : memref<9x128xf32, #tpu.memory_space<vmem>>, vector<1x128xf32>
    %44 = vector.shape_cast %43 : vector<1x128xf32> to vector<1x1x128xf32>
    %45 = vector.broadcast %44 : vector<1x1x128xf32> to vector<8x16x128xf32>
    %46 = arith.mulf %42, %45 : vector<8x16x128xf32>
    %47 = arith.addf %40, %46 : vector<8x16x128xf32>
    %c0_35 = arith.constant 0 : index
    %c2_36 = arith.constant 2 : index
    %c1_37 = arith.constant 1 : index
    %c0_38 = arith.constant 0 : index
    %48 = vector.load %arg1[%c0_35, %c2_36, %c1_37, %c0_38] : memref<1x10x18x128xf32, #tpu.memory_space<vmem>>, vector<1x8x16x128xf32>
    %49 = vector.shape_cast %48 : vector<1x8x16x128xf32> to vector<8x16x128xf32>
    %c7 = arith.constant 7 : index
    %c0_39 = arith.constant 0 : index
    %50 = vector.load %arg2[%c7, %c0_39] : memref<9x128xf32, #tpu.memory_space<vmem>>, vector<1x128xf32>
    %51 = vector.shape_cast %50 : vector<1x128xf32> to vector<1x1x128xf32>
    %52 = vector.broadcast %51 : vector<1x1x128xf32> to vector<8x16x128xf32>
    %53 = arith.mulf %49, %52 : vector<8x16x128xf32>
    %54 = arith.addf %47, %53 : vector<8x16x128xf32>
    %c0_40 = arith.constant 0 : index
    %c2_41 = arith.constant 2 : index
    %c2_42 = arith.constant 2 : index
    %c0_43 = arith.constant 0 : index
    %55 = vector.load %arg1[%c0_40, %c2_41, %c2_42, %c0_43] : memref<1x10x18x128xf32, #tpu.memory_space<vmem>>, vector<1x8x16x128xf32>
    %56 = vector.shape_cast %55 : vector<1x8x16x128xf32> to vector<8x16x128xf32>
    %c8 = arith.constant 8 : index
    %c0_44 = arith.constant 0 : index
    %57 = vector.load %arg2[%c8, %c0_44] : memref<9x128xf32, #tpu.memory_space<vmem>>, vector<1x128xf32>
    %58 = vector.shape_cast %57 : vector<1x128xf32> to vector<1x1x128xf32>
    %59 = vector.broadcast %58 : vector<1x1x128xf32> to vector<8x16x128xf32>
    %60 = arith.mulf %56, %59 : vector<8x16x128xf32>
    %61 = arith.addf %54, %60 : vector<8x16x128xf32>
    %62 = vector.shape_cast %61 : vector<8x16x128xf32> to vector<128x128xf32>
    %c0_45 = arith.constant 0 : index
    %c0_46 = arith.constant 0 : index
    %63 = vector.load %arg3[%c0_45, %c0_46] : memref<1x128xf32, #tpu.memory_space<vmem>>, vector<1x128xf32>
    %64 = vector.broadcast %63 : vector<1x128xf32> to vector<128x128xf32>
    %65 = arith.addf %62, %64 : vector<128x128xf32>
    %cst = arith.constant 0.000000e+00 : f32
    %66 = vector.broadcast %cst : f32 to vector<128x128xf32>
    %67 = arith.maximumf %65, %66 : vector<128x128xf32>
    %68 = arith.truncf %67 : vector<128x128xf32> to vector<128x128xbf16>
    %c0_47 = arith.constant 0 : index
    %c0_48 = arith.constant 0 : index
    %69 = vector.load %arg4[%c0_47, %c0_48] : memref<128x128xbf16, #tpu.memory_space<vmem>>, vector<128x128xbf16>
    %cst_49 = arith.constant dense<0.000000e+00> : vector<128x128xf32>
    %70 = tpu.matmul %68, %69, %cst_49 {dimension_numbers = #tpu.dot_dimension_numbers<[1], [0], [0], [1], [0, 0, 1, 1], [], []>} : vector<128x128xbf16>, vector<128x128xbf16>, vector<128x128xf32> -> vector<128x128xf32>
    %c0_50 = arith.constant 0 : index
    %c0_51 = arith.constant 0 : index
    %71 = vector.load %arg5[%c0_50, %c0_51] : memref<1x128xf32, #tpu.memory_space<vmem>>, vector<1x128xf32>
    %72 = vector.broadcast %71 : vector<1x128xf32> to vector<128x128xf32>
    %73 = arith.addf %70, %72 : vector<128x128xf32>
    %cst_52 = arith.constant 0.000000e+00 : f32
    %74 = vector.broadcast %cst_52 : f32 to vector<128x128xf32>
    %75 = arith.maximumf %73, %74 : vector<128x128xf32>
    %c0_53 = arith.constant 0 : index
    %c0_54 = arith.constant 0 : index
    %c0_55 = arith.constant 0 : index
    %76 = vector.load %arg6[%c0_53, %c0_54, %c0_55] : memref<1x128x128xf32, #tpu.memory_space<vmem>>, vector<1x128x128xf32>
    %77 = vector.shape_cast %76 : vector<1x128x128xf32> to vector<128x128xf32>
    %78 = vector.shape_cast %75 : vector<128x128xf32> to vector<1x128x128xf32>
    tpu.vector_store %arg6[%c0_53, %c0_54, %c0_55], %78 {strides = array<i32>} : memref<1x128x128xf32, #tpu.memory_space<vmem>>, vector<1x128x128xf32>,
    return
  }
  func.func @transform_0(%arg0: i32) -> (i32, i32, i32, i32) {
    %c0_i32 = arith.constant 0 : i32
    %c0_i32_0 = arith.constant 0 : i32
    %c0_i32_1 = arith.constant 0 : i32
    %c0_i32_2 = arith.constant 0 : i32
    return %arg0, %c0_i32, %c0_i32_0, %c0_i32_1 : i32, i32, i32, i32
  }
  func.func @transform_1(%arg0: i32) -> (i32, i32) {
    %c0_i32 = arith.constant 0 : i32
    %c0_i32_0 = arith.constant 0 : i32
    %c0_i32_1 = arith.constant 0 : i32
    return %c0_i32, %c0_i32_0 : i32, i32
  }
  func.func @transform_2(%arg0: i32) -> (i32, i32) {
    %c0_i32 = arith.constant 0 : i32
    %c0_i32_0 = arith.constant 0 : i32
    %c0_i32_1 = arith.constant 0 : i32
    return %c0_i32, %c0_i32_0 : i32, i32
  }
  func.func @transform_3(%arg0: i32) -> (i32, i32) {
    %c0_i32 = arith.constant 0 : i32
    %c0_i32_0 = arith.constant 0 : i32
    %c0_i32_1 = arith.constant 0 : i32
    return %c0_i32, %c0_i32_0 : i32, i32
  }
  func.func @transform_4(%arg0: i32) -> (i32, i32) {
    %c0_i32 = arith.constant 0 : i32
    %c0_i32_0 = arith.constant 0 : i32
    %c0_i32_1 = arith.constant 0 : i32
    return %c0_i32, %c0_i32_0 : i32, i32
  }
  func.func @transform_5(%arg0: i32) -> (i32, i32, i32) {
    %c0_i32 = arith.constant 0 : i32
    %c0_i32_0 = arith.constant 0 : i32
    %c0_i32_1 = arith.constant 0 : i32
    return %arg0, %c0_i32, %c0_i32_0 : i32, i32, i32
  }
}

</mosaic_0001>

<bundles_post_ra>
// kernel: tpu_custom_call.1
= control target key start
LH: loop header
LB: loop body
LE: loop exit
PB: predicated region body
PF: predicated region fallthrough
CT: control target
= control target key end

     0   :  { %10 = vsyncpa [#allocation3], 0  ;;  %s2004_s0 = inlined_call_operand.vmem [shape: f32[4,10,18,128], index: 0, kind: input, shape index: {}]   ;;  %s2005_s1 = inlined_call_operand.vmem [shape: f32[9,128], index: 1, kind: input, shape index: {}]   ;;  %s2006_s2 = inlined_call_operand.vmem [shape: f32[1,128], index: 2, kind: input, shape index: {}]   ;;  %s2007_s3 = inlined_call_operand.vmem [shape: bf16[128,128], index: 3, kind: input, shape index: {}]   ;;  %s2008_s4 = inlined_call_operand.vmem [shape: f32[1,128], index: 4, kind: input, shape index: {}]   ;;  %s2009_s5 = inlined_call_operand.hbm [shape: f32[4,128,128], index: 5, kind: output, shape index: {}]  }
   0x1   :  { %12 = vsyncpa [#allocation3 + $0x1], 0  ;;  %s1348_s18 = smov 0   ;;  %s1350_s19 = smov 0  }
   0x2   :  { %s1352_s20 = smov 0   ;;  %s1354_s21 = smov 0  }
   0x3 LB: > { %s1369_s22 = sadd.s32 4294967295, %s1313_s21   ;;  %s1010_s23 = sadd.s32 4294967294, %s1313_s21   ;;  %s1313_s21 = sphi %s1354_s21, %s2033_s21   ;;  %s1309_s20 = sphi %s1352_s20, %s2032_s20   ;;  %s1305_s19 = sphi %s1350_s19, %s2031_s19   ;;  %s1301_s18 = sphi %s1348_s18, %s2030_s18  }
   0x4   : > { %s1373_s24 = sadd.s32 1, %s1313_s21   ;;  %s135_s25 = sadd.s32 1, %s1309_s20 }
   0x5   : > { %s132_s26 = ssub.s32 %s1313_s21, %s1373_s24  ;;  %p145_p0 = scmp.ne.s32.totalorder %s1309_s20, %s1305_s19 }
   0x6   : > { %p133_p1 = scmp.eq.s32.totalorder %s132_s26, 0  ;;  %p146_p2 = scmp.eq.s32.totalorder %s1369_s22, 3 }
   0x7   : > { %p151_p3 = scmp.ne.s32.totalorder %s1305_s19, %s1301_s18  ;;  %p152_p4 = scmp.eq.s32.totalorder %s1010_s23, 3 }
   0x8   : > { %s1384_s27 = scalar_select %p133_p1, %s1309_s20, %s135_s25  }
   0x9   : > { %p1386_p5 = por %p146_p2, %p145_p0  ;;  %p1390_p6 = por %p152_p4, %p151_p3 }
   0xa   : > { %p1013_p7 = scmp.ge.s32.totalorder %s1313_s21, 1  ;;  %p190_p8 = scmp.lt.s32.totalorder %s1313_s21, 5 }
   0xc   : > { %p191_p9 = pnand %p1013_p7, %p190_p8 }
   0xe   : > { %194 = sbr.rel (%p191_p9) target bundleno = 355 (0x163), region = 40 }
  0x15   : > { %v1243_v0 = vld [vmem:[%s2007_s3] sm:$0xff]   ;;  %p218_p10 = scmp.lt.s32.totalorder %s1369_s22, 3  ;;  %v1244_v1 = vld [vmem:[%s2007_s3 + $0x8] sm:$0xff]   ;;  %v1245_v2 = vld [vmem:[%s2007_s3 + $0x10] sm:$0xff]   ;;  %s1136_s26 = sshll.u32 %s1369_s22, 11 }
  0x16   : > { %1153 = vmatprep.subr.bf16.mxu0 %v1243_v0  ;;  %1185 = vmatprep.subr.bf16.mxu1 %v1243_v0  ;;  %v1246_v3 = vld [vmem:[%s2007_s3 + $0x18] sm:$0xff]   ;;  %v1420_v6 = vld [vmem:[%s2005_s1] ss:$0 sm:$0xff]  ;;  %v1429_v11 = vld [vmem:[%s2005_s1 + $0x1] ss:$0 sm:$0xff]  ;;  %s1954_s8 = scalar_lea.hbm %s2009_s5, %s1136_s26  ;;  %s1315_s10 = smov [#allocation2]  }
  0x17   : > { %s219_s9 = scalar_select %p218_p10, %s1369_s22, 3  ;;  %1154 = vmatpush3.bf16.msra.mxu0 %v1243_v0  ;;  %1193 = vmatpush3.bf16.msra.mxu1 %v1243_v0  ;;  %v1434_v12 = vld [vmem:[%s2007_s3 + $0x20] sm:$0xff]   ;;  %v1248_v36 = vld [vmem:[%s2007_s3 + $0x28] sm:$0xff]  }
  0x18   : > { %1155 = vmatprep.subr.bf16.mxu0 %v1244_v1  ;;  %1186 = vmatprep.subr.bf16.mxu1 %v1244_v1  ;;  %v1443_v17 = vld [vmem:[%s2005_s1 + $0x2] ss:$0 sm:$0xff]  ;;  %v1452_v22 = vld [vmem:[%s2005_s1 + $0x3] ss:$0 sm:$0xff]  ;;  %v1462_v28 = vld [vmem:[%s2005_s1 + $0x4] ss:$0 sm:$0xff] }
  0x19   : > { %s1201_s12 = smul.u32 240, %s219_s9  ;;  %v1477_v34 = vld [vmem:[%s2005_s1 + $0x5] ss:$0 sm:$0xff]  ;;  %v1498_v43 = vld [vmem:[%s2005_s1 + $0x6] ss:$0 sm:$0xff]  ;;  %s1255_s11 = sshll.u32 %s1315_s10, 4  ;;  %s1256_s11 = int_to_ptr.vmem [resolvable:$false] %s1255_s11 }
  0x1a   : > { %v1513_v48 = vld [vmem:[%s2005_s1 + $0x7] ss:$0 sm:$0xff]  ;;  %v1531_v55 = vld [vmem:[%s2005_s1 + $0x8] ss:$0 sm:$0xff] }
  0x1b   : > { %s1410_s15 = scalar_lea.vmem %s2004_s0, %s1201_s12  ;;  %1156 = vmatpush3.bf16.msra.mxu0 %v1244_v1  ;;  %1194 = vmatpush3.bf16.msra.mxu1 %v1244_v1  ;;  %s1257_s12 = scalar_lea.vmem %s1256_s11, 4096 }
  0x1c   : > { %1157 = vmatprep.subr.bf16.mxu0 %v1245_v2  ;;  %1187 = vmatprep.subr.bf16.mxu1 %v1245_v2  ;;  %v224_v4 = vld [vmem:[%s1410_s15] sm:$0xff]  ;;  %v225_v5 = vld [vmem:[%s1410_s15 + $0x8] sm:$0xff]  ;;  %v1019_v20 = vld [vmem:[%s1410_s15 + $0x18] sm:$0xff] }
  0x1d   : > { %v245_v7 = vmul.f32 %v1420_v6, %v224_v4  ;;  %v246_v8 = vmul.f32 %v1420_v6, %v225_v5  ;;  %v261_v9 = vld [vmem:[%s1410_s15 + $0x1] sm:$0xff]  ;;  %v262_v10 = vld [vmem:[%s1410_s15 + $0x9] sm:$0xff]  ;;  %v389_v25 = vmul.f32 %v1452_v22, %v1019_v20  ;;  %v1036_v26 = vld [vmem:[%s1410_s15 + $0x19] sm:$0xff]  ;;  %v1480_v35 = vmul.f32 %v1019_v20, %v1420_v6 }
  0x1e   : > { %v282_v13 = vmul.f32 %v1429_v11, %v261_v9  ;;  %v283_v14 = vmul.f32 %v1429_v11, %v262_v10  ;;  %v314_v15 = vld [vmem:[%s1410_s15 + $0x2] sm:$0xff]  ;;  %v315_v16 = vld [vmem:[%s1410_s15 + $0xa] sm:$0xff]  ;;  %v442_v30 = vmul.f32 %v1462_v28, %v1036_v26  ;;  %v1469_v32 = vld [vmem:[%s1410_s15 + $0x1a] sm:$0xff]  ;;  %v1546_v61 = vmul.f32 %v1036_v26, %v1429_v11 }
  0x1f   : > { %1158 = vmatpush3.bf16.msra.mxu0 %v1245_v2  ;;  %1195 = vmatpush3.bf16.msra.mxu1 %v1245_v2  ;;  %v335_v18 = vmul.f32 %v1443_v17, %v314_v15  ;;  %v336_v19 = vmul.f32 %v1443_v17, %v315_v16  ;;  %v1020_v21 = vld [vmem:[%s1410_s15 + $0x20] sm:$0xff]  ;;  %v495_v39 = vmul.f32 %v1477_v34, %v1469_v32  ;;  %v1490_v41 = vld [vmem:[%s1410_s15 + $0x30] sm:$0xff]  ;;  %v1493_v42 = vld [vmem:[%s1410_s15 + $0x38] sm:$0xff] }
  0x20   : > { %1159 = vmatprep.subr.bf16.mxu0 %v1246_v3  ;;  %1188 = vmatprep.subr.bf16.mxu1 %v1246_v3  ;;  %v298_v23 = vadd.f32 %v282_v13, %v245_v7  ;;  %v299_v24 = vadd.f32 %v283_v14, %v246_v8  ;;  %v1457_v27 = vld [vmem:[%s1410_s15 + $0x21] sm:$0xff]  ;;  %v390_v29 = vmul.f32 %v1452_v22, %v1020_v21  ;;  %v1505_v46 = vld [vmem:[%s1410_s15 + $0x31] sm:$0xff]  ;;  %v1508_v47 = vld [vmem:[%s1410_s15 + $0x39] sm:$0xff] }
  0x21   : > { %v443_v31 = vmul.f32 %v1462_v28, %v1457_v27  ;;  %v1472_v33 = vld [vmem:[%s1410_s15 + $0x22] sm:$0xff]  ;;  %v549_v44 = vmul.f32 %v1498_v43, %v1490_v41  ;;  %v550_v45 = vmul.f32 %v1498_v43, %v1493_v42  ;;  %v1516_v49 = vmul.f32 %v1020_v21, %v1420_v6  ;;  %v1523_v53 = vld [vmem:[%s1410_s15 + $0x32] sm:$0xff]  ;;  %v1526_v54 = vld [vmem:[%s1410_s15 + $0x3a] sm:$0xff] }
  0x22   : > { %v351_v37 = vadd.f32 %v335_v18, %v298_v23  ;;  %v352_v38 = vadd.f32 %v336_v19, %v299_v24  ;;  %v496_v40 = vmul.f32 %v1477_v34, %v1472_v33  ;;  %v602_v52 = vmul.f32 %v1513_v48, %v1505_v46  ;;  %v1540_v59 = vld [vmem:[%s1410_s15 + $0x60] sm:$0xff]  ;;  %v1543_v60 = vld [vmem:[%s1410_s15 + $0x68] sm:$0xff]  ;;  %v1249_v10 = vld [vmem:[%s2007_s3 + $0x30] sm:$0xff]  }
  0x23   : > { %1160 = vmatpush3.bf16.msra.mxu0 %v1246_v3  ;;  %1196 = vmatpush3.bf16.msra.mxu1 %v1246_v3  ;;  %v603_v56 = vmul.f32 %v1513_v48, %v1508_v47  ;;  %v655_v57 = vmul.f32 %v1531_v55, %v1523_v53  ;;  %v656_v58 = vmul.f32 %v1531_v55, %v1526_v54  ;;  %v1553_v2 = vld [vmem:[%s1410_s15 + $0x61] sm:$0xff]  ;;  %v1556_v3 = vld [vmem:[%s1410_s15 + $0x69] sm:$0xff]  ;;  %v1578_v15 = vld [vmem:[%s1410_s15 + $0x78] sm:$0xff] }
  0x24   : > { %1161 = vmatprep.subr.bf16.mxu0 %v1434_v12  ;;  %1189 = vmatprep.subr.bf16.mxu1 %v1434_v12  ;;  %v405_v50 = vadd.f32 %v389_v25, %v351_v37  ;;  %v406_v51 = vadd.f32 %v390_v29, %v352_v38  ;;  %v253_v0 = vmul.f32 %v1420_v6, %v1540_v59  ;;  %v1559_v4 = vld [vmem:[%s1410_s15 + $0x62] sm:$0xff]  ;;  %v1568_v8 = vld [vmem:[%s1410_s15 + $0x6a] sm:$0xff]  ;;  %v1588_v23 = vld [vmem:[%s1410_s15 + $0x79] sm:$0xff] }
  0x25   : > { %v254_v1 = vmul.f32 %v1420_v6, %v1543_v60  ;;  %v290_v5 = vmul.f32 %v1429_v11, %v1553_v2  ;;  %v291_v7 = vmul.f32 %v1429_v11, %v1556_v3  ;;  %v343_v9 = vmul.f32 %v1443_v17, %v1559_v4  ;;  %2018 = vst [vmem:[#allocation5_spill] sm:$0xff] %v1578_v15  ;;  %v1581_v16 = vld [vmem:[%s1410_s15 + $0x80] sm:$0xff] }
  0x26   : > { %v458_v62 = vadd.f32 %v442_v30, %v405_v50  ;;  %v459_v63 = vadd.f32 %v443_v31, %v406_v51  ;;  %v344_v14 = vmul.f32 %v1443_v17, %v1568_v8  ;;  %2019 = vst [vmem:[#allocation6_spill] sm:$0xff] %v1581_v16  ;;  %v397_v20 = vmul.f32 %v1452_v22, %v1578_v15  ;;  %v1591_v24 = vld [vmem:[%s1410_s15 + $0x81] sm:$0xff]  ;;  %v1611_v51 = vld [vmem:[%s1410_s15 + $0x90] sm:$0xff] }
  0x27   : > { %1162 = vmatpush3.bf16.msra.mxu0 %v1434_v12  ;;  %1197 = vmatpush3.bf16.msra.mxu1 %v1434_v12  ;;  %v306_v18 = vadd.f32 %v290_v5, %v253_v0  ;;  %v307_v19 = vadd.f32 %v291_v7, %v254_v1  ;;  %v398_v21 = vmul.f32 %v1452_v22, %v1581_v16  ;;  %v1598_v31 = vld [vmem:[%s1410_s15 + $0x7a] sm:$0xff]  ;;  %v1626_v5 = vld [vmem:[%s1410_s15 + $0x91] sm:$0xff] }
  0x28   : > { %1163 = vmatprep.subr.bf16.mxu0 %v1248_v36  ;;  %1190 = vmatprep.subr.bf16.mxu1 %v1248_v36  ;;  %v511_v12 = vadd.f32 %v495_v39, %v458_v62  ;;  %v512_v13 = vadd.f32 %v496_v40, %v459_v63  ;;  %2020 = vst [vmem:[#allocation7_spill] sm:$0xff] %v1588_v23  ;;  %2021 = vst [vmem:[#allocation8_spill] sm:$0xff] %v1591_v24  ;;  %v1601_v39 = vld [vmem:[%s1410_s15 + $0x82] sm:$0xff]  ;;  %v1614_v62 = vld [vmem:[%s1410_s15 + $0x98] sm:$0xff] }
  0x29   : > { %v450_v29 = vmul.f32 %v1462_v28, %v1588_v23  ;;  %v451_v30 = vmul.f32 %v1462_v28, %v1591_v24  ;;  %2022 = vst [vmem:[#allocation9_spill] sm:$0xff] %v1598_v31  ;;  %v359_v37 = vadd.f32 %v343_v9, %v306_v18  ;;  %v360_v38 = vadd.f32 %v344_v14, %v307_v19  ;;  %v1619_v63 = vld [vmem:[%s2006_s2] ss:$0 sm:$0xff]  ;;  %v1636_v18 = vld [vmem:[%s1410_s15 + $0x92] sm:$0xff] }
  0x2a   : > { %v565_v25 = vadd.f32 %v549_v44, %v511_v12  ;;  %v566_v26 = vadd.f32 %v550_v45, %v512_v13  ;;  %2023 = vst [vmem:[#allocation10_spill] sm:$0xff] %v1601_v39  ;;  %v503_v40 = vmul.f32 %v1477_v34, %v1598_v31  ;;  %v1250_v44 = vld [vmem:[%s2007_s3 + $0x38] sm:$0xff]   ;;  %v610_v13 = vmul.f32 %v1513_v48, %v1626_v5 }
  0x2b   : > { %1164 = vmatpush3.bf16.msra.mxu0 %v1248_v36  ;;  %1198 = vmatpush3.bf16.msra.mxu1 %v1248_v36  ;;  %v504_v36 = vmul.f32 %v1477_v34, %v1601_v39  ;;  %v413_v0 = vadd.f32 %v397_v20, %v359_v37  ;;  %v414_v1 = vadd.f32 %v398_v21, %v360_v38  ;;  %v1629_v7 = vld [vmem:[%s1410_s15 + $0x99] sm:$0xff] }
  0x2c   : > { %1165 = vmatprep.subr.bf16.mxu0 %v1249_v10  ;;  %1191 = vmatprep.subr.bf16.mxu1 %v1249_v10  ;;  %v618_v45 = vadd.f32 %v602_v52, %v565_v25  ;;  %v619_v50 = vadd.f32 %v603_v56, %v566_v26  ;;  %v557_v52 = vmul.f32 %v1498_v43, %v1611_v51  ;;  %v1639_v21 = vld [vmem:[%s1410_s15 + $0x9a] sm:$0xff] }
  0x2d   : > { %v558_v56 = vmul.f32 %v1498_v43, %v1614_v62  ;;  %v611_v14 = vmul.f32 %v1513_v48, %v1629_v7  ;;  %v466_v19 = vadd.f32 %v450_v29, %v413_v0  ;;  %v467_v20 = vadd.f32 %v451_v30, %v414_v1 }
  0x2e   : > { %v671_v9 = vadd.f32 %v655_v57, %v618_v45  ;;  %v672_v12 = vadd.f32 %v656_v58, %v619_v50  ;;  %v663_v25 = vmul.f32 %v1531_v55, %v1636_v18  ;;  %v664_v26 = vmul.f32 %v1531_v55, %v1639_v21 }
  0x2f   : > { %1166 = vmatpush3.bf16.msra.mxu0 %v1249_v10  ;;  %1199 = vmatpush3.bf16.msra.mxu1 %v1249_v10  ;;  %v519_v37 = vadd.f32 %v503_v40, %v466_v19  ;;  %v520_v38 = vadd.f32 %v504_v36, %v467_v20  ;;  %v285_v10 = vmul.f32 %v1457_v27, %v1429_v11  ;;  %v1669_v20 = vld [vmem:[%s1410_s15 + $0x48] sm:$0xff] }
  0x30   : > { %1167 = vmatprep.subr.bf16.mxu0 %v1250_v44  ;;  %1192 = vmatprep.subr.bf16.mxu1 %v1250_v44  ;;  %v694_v57 = vadd.f32 %v1619_v63, %v671_v9  ;;  %v695_v58 = vadd.f32 %v1619_v63, %v672_v12  ;;  %v300_v29 = vadd.f32 %v1546_v61, %v1480_v35 }
  0x31   : > { %v337_v50 = vmul.f32 %v1469_v32, %v1443_v17  ;;  %v338_v0 = vmul.f32 %v1472_v33, %v1443_v17  ;;  %v573_v1 = vadd.f32 %v557_v52, %v519_v37  ;;  %v574_v40 = vadd.f32 %v558_v56, %v520_v38  ;;  %v1677_v38 = vld [vmem:[%s1410_s15 + $0x49] sm:$0xff] }
  0x32   : > { %v710_v30 = vmax.f32 %v694_v57, 0.0  ;;  %v711_v45 = vmax.f32 %v695_v58, 0.0  ;;  %v301_v36 = vadd.f32 %v285_v10, %v1516_v49  ;;  %v391_v35 = vmul.f32 %v1490_v41, %v1452_v22  ;;  %v1672_v58 = vld [vmem:[%s1410_s15 + $0x50] sm:$0xff] }
  0x33   : > { %1168 = vmatpush3.bf16.msra.mxu0 %v1250_v44  ;;  %1200 = vmatpush3.bf16.msra.mxu1 %v1250_v44  ;;  %v353_v27 = vadd.f32 %v337_v50, %v300_v29  ;;  %v392_v61 = vmul.f32 %v1493_v42, %v1452_v22  ;;  %v626_v32 = vadd.f32 %v610_v13, %v573_v1  ;;  %v1680_v10 = vld [vmem:[%s1410_s15 + $0x51] sm:$0xff] }
  0x34   : > { %v726_v9 = vpack.c.bf16 %v711_v45, %v710_v30  ;;  %v627_v33 = vadd.f32 %v611_v14, %v574_v40  ;;  %v354_v12 = vadd.f32 %v338_v0, %v301_v36  ;;  %v444_v44 = vmul.f32 %v1505_v46, %v1462_v28  ;;  %v1694_v40 = vld [vmem:[%s1410_s15 + $0x52] sm:$0xff] }
  0x35   : > { %v407_v52 = vadd.f32 %v391_v35, %v353_v27  ;;  %v445_v49 = vmul.f32 %v1508_v47, %v1462_v28  ;;  %v497_v56 = vmul.f32 %v1523_v53, %v1477_v34  ;;  %v498_v19 = vmul.f32 %v1526_v54, %v1477_v34 }
  0x36   : > { %1169 = vmatprep.mubr.bf16.mxu0 %v726_v9  ;;  %v679_v13 = vadd.f32 %v663_v25, %v626_v32  ;;  %v680_v14 = vadd.f32 %v664_v26, %v627_v33  ;;  %v408_v57 = vadd.f32 %v392_v61, %v354_v12  ;;  %v551_v37 = vmul.f32 %v1498_v43, %v1669_v20  ;;  %v1689_v26 = vld [vmem:[%s1410_s15 + $0x4a] sm:$0xff] }
  0x37   : > { %v460_v29 = vadd.f32 %v444_v44, %v407_v52  ;;  %v552_v30 = vmul.f32 %v1498_v43, %v1672_v58  ;;  %v604_v45 = vmul.f32 %v1513_v48, %v1677_v38  ;;  %v605_v25 = vmul.f32 %v1513_v48, %v1680_v10 }
  0x38   : > { %v702_v50 = vadd.f32 %v1619_v63, %v679_v13  ;;  %v703_v0 = vadd.f32 %v1619_v63, %v680_v14  ;;  %v461_v1 = vadd.f32 %v445_v49, %v408_v57  ;;  %v657_v36 = vmul.f32 %v1531_v55, %v1689_v26 }
  0x39   : > { %v513_v9 = vadd.f32 %v497_v56, %v460_v29  ;;  %v658_v27 = vmul.f32 %v1531_v55, %v1694_v40  ;;  %v255_v35 = vmul.f32 %v1578_v15, %v1420_v6  ;;  %v256_v61 = vmul.f32 %v1581_v16, %v1420_v6 }
  0x3a   : > { %v718_v32 = vmax.f32 %v702_v50, 0.0  ;;  %v719_v33 = vmax.f32 %v703_v0, 0.0  ;;  %v514_v12 = vadd.f32 %v498_v19, %v461_v1  ;;  %v292_v44 = vmul.f32 %v1588_v23, %v1429_v11 }
  0x3b   : > { %v567_v52 = vadd.f32 %v551_v37, %v513_v9  ;;  %v293_v49 = vmul.f32 %v1591_v24, %v1429_v11  ;;  %v345_v56 = vmul.f32 %v1598_v31, %v1443_v17  ;;  %v346_v13 = vmul.f32 %v1601_v39, %v1443_v17  ;;  %v1749_v39 = vld [vmem:[%s1410_s15 + $0xb2] sm:$0xff] }
  0x3c   : > { %v730_v14 = vpack.c.bf16 %v719_v33, %v718_v32  ;;  %v568_v57 = vadd.f32 %v552_v30, %v514_v12  ;;  %v308_v29 = vadd.f32 %v292_v44, %v255_v35  ;;  %v399_v19 = vmul.f32 %v1611_v51, %v1452_v22  ;;  %v1723_v33 = vld [vmem:[%s1410_s15 + $0xa8] sm:$0xff]  ;;  %v1728_v44 = vld [vmem:[%s1410_s15 + $0xb0] sm:$0xff] }
  0x3d   : > { %v620_v50 = vadd.f32 %v604_v45, %v567_v52  ;;  %v309_v37 = vadd.f32 %v293_v49, %v256_v61  ;;  %v400_v0 = vmul.f32 %v1614_v62, %v1452_v22  ;;  %v452_v1 = vmul.f32 %v1626_v5, %v1462_v28  ;;  %v1733_v52 = vld [vmem:[%s1410_s15 + $0xa9] sm:$0xff] }
  0x3e   : > { %1177 = vmatprep.mubr.bf16.mxu1 %v730_v14  ;;  %v621_v9 = vadd.f32 %v605_v25, %v568_v57  ;;  %v361_v32 = vadd.f32 %v345_v56, %v308_v29  ;;  %v453_v30 = vmul.f32 %v1629_v7, %v1462_v28  ;;  %v505_v35 = vmul.f32 %v1636_v18, %v1477_v34  ;;  %v1738_v57 = vld [vmem:[%s1410_s15 + $0xb1] sm:$0xff] }
  0x3f   : > { %v673_v45 = vadd.f32 %v657_v36, %v620_v50  ;;  %v362_v61 = vadd.f32 %v346_v13, %v309_v37  ;;  %v506_v12 = vmul.f32 %v1639_v21, %v1477_v34  ;;  %v559_v25 = vmul.f32 %v1498_v43, %v1723_v33  ;;  %v1743_v13 = vld [vmem:[%s1410_s15 + $0xaa] sm:$0xff] }
  0x40   : > { %v674_v49 = vadd.f32 %v658_v27, %v621_v9  ;;  %v415_v56 = vadd.f32 %v399_v19, %v361_v32  ;;  %v560_v14 = vmul.f32 %v1498_v43, %v1728_v44  ;;  %v612_v36 = vmul.f32 %v1513_v48, %v1733_v52 }
  0x41   : > { %v696_v29 = vadd.f32 %v1619_v63, %v673_v45  ;;  %v416_v50 = vadd.f32 %v400_v0, %v362_v61  ;;  %v613_v37 = vmul.f32 %v1513_v48, %v1738_v57  ;;  %v665_v27 = vmul.f32 %v1531_v55, %v1743_v13 }
  0x42   : > { %v697_v19 = vadd.f32 %v1619_v63, %v674_v49  ;;  %v468_v9 = vadd.f32 %v452_v1, %v415_v56  ;;  %v666_v32 = vmul.f32 %v1531_v55, %v1749_v39  ;;  %v249_v31 = vmul.f32 %v1490_v41, %v1420_v6 }
  0x43   : > { %v712_v24 = vmax.f32 %v696_v29, 0.0  ;;  %v469_v45 = vadd.f32 %v453_v30, %v416_v50  ;;  %v250_v0 = vmul.f32 %v1493_v42, %v1420_v6  ;;  %v286_v61 = vmul.f32 %v1505_v46, %v1429_v11 }
  0x44   : > { %v713_v23 = vmax.f32 %v697_v19, 0.0  ;;  %v521_v16 = vadd.f32 %v505_v35, %v468_v9  ;;  %v287_v49 = vmul.f32 %v1508_v47, %v1429_v11  ;;  %v339_v1 = vmul.f32 %v1523_v53, %v1443_v17 }
  0x45   : > { %v522_v56 = vadd.f32 %v506_v12, %v469_v45  ;;  %v302_v15 = vadd.f32 %v286_v61, %v249_v31  ;;  %v340_v41 = vmul.f32 %v1526_v54, %v1443_v17  ;;  %v393_v30 = vmul.f32 %v1669_v20, %v1452_v22 }
  0x46   : > { %v727_v42 = vpack.c.bf16 %v713_v23, %v712_v24  ;;  %v575_v29 = vadd.f32 %v559_v25, %v521_v16  ;;  %v303_v50 = vadd.f32 %v287_v49, %v250_v0  ;;  %v394_v46 = vmul.f32 %v1672_v58, %v1452_v22 }
  0x47   : > { %v576_v35 = vadd.f32 %v560_v14, %v522_v56  ;;  %v355_v19 = vadd.f32 %v339_v1, %v302_v15  ;;  %v446_v47 = vmul.f32 %v1677_v38, %v1462_v28  ;;  %v447_v53 = vmul.f32 %v1680_v10, %v1462_v28 }
  0x48   : > { %1170 = vmatmul.mubr.bf16.vlgmr.msra.gmra.mrb[0].mxu0 %v727_v42  ;;  %v628_v31 = vadd.f32 %v612_v36, %v575_v29  ;;  %v356_v54 = vadd.f32 %v340_v41, %v303_v50  ;;  %v499_v12 = vmul.f32 %v1689_v26, %v1477_v34  ;;  %v500_v16 = vmul.f32 %v1694_v40, %v1477_v34 }
  0x49   : > { %v629_v23 = vadd.f32 %v613_v37, %v576_v35  ;;  %v409_v24 = vadd.f32 %v393_v30, %v355_v19  ;;  %v553_v15 = vmul.f32 %v1498_v43, %v1540_v59  ;;  %v554_v25 = vmul.f32 %v1498_v43, %v1543_v60 }
  0x4a   : > { %v681_v14 = vadd.f32 %v665_v27, %v628_v31  ;;  %v410_v9 = vadd.f32 %v394_v46, %v356_v54  ;;  %v606_v36 = vmul.f32 %v1513_v48, %v1553_v2  ;;  %v607_v45 = vmul.f32 %v1513_v48, %v1556_v3 }
  0x4b   : > { %v682_v0 = vadd.f32 %v666_v32, %v629_v23  ;;  %v462_v61 = vadd.f32 %v446_v47, %v409_v24  ;;  %v659_v37 = vmul.f32 %v1531_v55, %v1559_v4  ;;  %v660_v49 = vmul.f32 %v1531_v55, %v1568_v8 }
  0x4c   : > { %v704_v1 = vadd.f32 %v1619_v63, %v681_v14  ;;  %v463_v56 = vadd.f32 %v447_v53, %v410_v9  ;;  %v257_v27 = vmul.f32 %v1611_v51, %v1420_v6  ;;  %v258_v41 = vmul.f32 %v1614_v62, %v1420_v6  ;;  %v1819_v14 = vld [vmem:[%s1410_s15 + $0xc0] sm:$0xff] }
  0x4d   : > { %v705_v30 = vadd.f32 %v1619_v63, %v682_v0  ;;  %v515_v42 = vadd.f32 %v499_v12, %v462_v61  ;;  %v294_v32 = vmul.f32 %v1626_v5, %v1429_v11  ;;  %v295_v29 = vmul.f32 %v1629_v7, %v1429_v11  ;;  %v1822_v61 = vld [vmem:[%s1410_s15 + $0xc8] sm:$0xff] }
  0x4e   : > { %v720_v50 = vmax.f32 %v704_v1, 0.0  ;;  %v516_v46 = vadd.f32 %v500_v16, %v463_v56  ;;  %v347_v35 = vmul.f32 %v1636_v18, %v1443_v17  ;;  %v348_v51 = vmul.f32 %v1639_v21, %v1443_v17  ;;  %v1827_v1 = vld [vmem:[%s1410_s15 + $0xc1] sm:$0xff]  ;;  %v1830_v56 = vld [vmem:[%s1410_s15 + $0xc9] sm:$0xff] }
  0x4f   : > { %v721_v19 = vmax.f32 %v705_v30, 0.0  ;;  %v569_v62 = vadd.f32 %v553_v15, %v515_v42  ;;  %v310_v47 = vadd.f32 %v294_v32, %v257_v27  ;;  %v311_v53 = vadd.f32 %v295_v29, %v258_v41  ;;  %v1839_v42 = vld [vmem:[%s1410_s15 + $0xc2] sm:$0xff] }
  0x50   : > { %v570_v31 = vadd.f32 %v554_v25, %v516_v46  ;;  %v401_v5 = vmul.f32 %v1723_v33, %v1452_v22  ;;  %v402_v7 = vmul.f32 %v1728_v44, %v1452_v22  ;;  %v454_v54 = vmul.f32 %v1733_v52, %v1462_v28  ;;  %v1843_v46 = vld [vmem:[%s1410_s15 + $0xca] sm:$0xff] }
  0x51   : > { %v731_v18 = vpack.c.bf16 %v721_v19, %v720_v50  ;;  %v622_v21 = vadd.f32 %v606_v36, %v569_v62  ;;  %v363_v12 = vadd.f32 %v347_v35, %v310_v47  ;;  %v364_v16 = vadd.f32 %v348_v51, %v311_v53 }
  0x52   : > { %v623_v23 = vadd.f32 %v607_v45, %v570_v31  ;;  %v455_v24 = vmul.f32 %v1738_v57, %v1462_v28  ;;  %v507_v15 = vmul.f32 %v1743_v13, %v1477_v34  ;;  %v508_v25 = vmul.f32 %v1749_v39, %v1477_v34 }
  0x53   : > { %1178 = vmatmul.mubr.bf16.vlgmr.msra.gmra.mrb[0].mxu1 %v731_v18  ;;  %v675_v9 = vadd.f32 %v659_v37, %v622_v21  ;;  %v417_v0 = vadd.f32 %v401_v5, %v363_v12  ;;  %v418_v36 = vadd.f32 %v402_v7, %v364_v16  ;;  %v561_v45 = vmul.f32 %v1498_v43, %v1819_v14 }
  0x54   : > { %v676_v27 = vadd.f32 %v660_v49, %v623_v23  ;;  %v562_v41 = vmul.f32 %v1498_v43, %v1822_v61  ;;  %v614_v30 = vmul.f32 %v1513_v48, %v1827_v1  ;;  %v615_v37 = vmul.f32 %v1513_v48, %v1830_v56 }
  0x55   : > { %v698_v32 = vadd.f32 %v1619_v63, %v675_v9  ;;  %v470_v29 = vadd.f32 %v454_v54, %v417_v0  ;;  %v471_v50 = vadd.f32 %v455_v24, %v418_v36  ;;  %v667_v49 = vmul.f32 %v1531_v55, %v1839_v42  ;;  %v2024_v36 = vld [vmem:[#allocation5_spill] sm:$0xff] }
  0x56   : > { %v699_v35 = vadd.f32 %v1619_v63, %v676_v27  ;;  %v668_v51 = vmul.f32 %v1531_v55, %v1843_v46  ;;  %v251_v19 = vmul.f32 %v1669_v20, %v1420_v6  ;;  %v252_v62 = vmul.f32 %v1672_v58, %v1420_v6 }
  0x57   : > { %v714_v47 = vmax.f32 %v698_v32, 0.0  ;;  %v523_v53 = vadd.f32 %v507_v15, %v470_v29  ;;  %v524_v31 = vadd.f32 %v508_v25, %v471_v50  ;;  %v288_v5 = vmul.f32 %v1677_v38, %v1429_v11  ;;  %v2026_v32 = vld [vmem:[#allocation7_spill] sm:$0xff]  ;;  %v2027_v29 = vld [vmem:[#allocation8_spill] sm:$0xff] }
  0x58   : > { %v715_v7 = vmax.f32 %v699_v35, 0.0  ;;  %v289_v54 = vmul.f32 %v1680_v10, %v1429_v11  ;;  %v341_v18 = vmul.f32 %v1689_v26, %v1443_v17  ;;  %v342_v21 = vmul.f32 %v1694_v40, %v1443_v17 }
  0x59   : > { %v577_v20 = vadd.f32 %v561_v45, %v523_v53  ;;  %v578_v12 = vadd.f32 %v562_v41, %v524_v31  ;;  %v304_v16 = vadd.f32 %v288_v5, %v251_v19  ;;  %v395_v58 = vmul.f32 %v1452_v22, %v1540_v59  ;;  %v2025_v41 = vld [vmem:[#allocation6_spill] sm:$0xff] }
  0x5a   : > { %v728_v23 = vpack.c.bf16 %v715_v7, %v714_v47  ;;  %v305_v24 = vadd.f32 %v289_v54, %v252_v62  ;;  %v396_v38 = vmul.f32 %v1452_v22, %v1543_v60  ;;  %v448_v10 = vmul.f32 %v1462_v28, %v1553_v2 }
  0x5b   : > { %v630_v15 = vadd.f32 %v614_v30, %v577_v20  ;;  %v631_v25 = vadd.f32 %v615_v37, %v578_v12  ;;  %v357_v26 = vadd.f32 %v341_v18, %v304_v16  ;;  %v449_v40 = vmul.f32 %v1462_v28, %v1556_v3 }
  0x5c   : > { %1173 = vmatprep.mubr.bf16.mxu0 %v728_v23  ;;  %v358_v9 = vadd.f32 %v342_v21, %v305_v24  ;;  %v501_v0 = vmul.f32 %v1477_v34, %v1559_v4  ;;  %v502_v59 = vmul.f32 %v1477_v34, %v1568_v8  ;;  %v555_v60 = vmul.f32 %v1498_v43, %v2024_v36  ;;  %v2028_v4 = vld [vmem:[#allocation9_spill] sm:$0xff] }
  0x5d   : > { %v683_v45 = vadd.f32 %v667_v49, %v630_v15  ;;  %v684_v27 = vadd.f32 %v668_v51, %v631_v25  ;;  %v411_v2 = vadd.f32 %v395_v58, %v357_v26  ;;  %v556_v30 = vmul.f32 %v1498_v43, %v2025_v41  ;;  %v2029_v51 = vld [vmem:[#allocation10_spill] sm:$0xff]  ;;  %v1085_v25 = vld [vmem:[%s1410_s15 + $0xe0] sm:$0xff] }
  0x5e   : > { %v412_v37 = vadd.f32 %v396_v38, %v358_v9  ;;  %v608_v3 = vmul.f32 %v1513_v48, %v2026_v32  ;;  %v609_v50 = vmul.f32 %v1513_v48, %v2027_v29  ;;  %v661_v35 = vmul.f32 %v1531_v55, %v2028_v4  ;;  %v1084_v38 = vld [vmem:[%s1410_s15 + $0xd8] sm:$0xff] }
  0x5f   : > { %v706_v8 = vadd.f32 %v1619_v63, %v683_v45  ;;  %v707_v19 = vadd.f32 %v1619_v63, %v684_v27  ;;  %v464_v49 = vadd.f32 %v448_v10, %v411_v2  ;;  %v662_v62 = vmul.f32 %v1531_v55, %v2029_v51  ;;  %v1101_v26 = vld [vmem:[%s1410_s15 + $0xd9] sm:$0xff]  ;;  %v1119_v2 = vld [vmem:[%s1410_s15 + $0xe2] sm:$0xff] }
  0x60   : > { %v465_v47 = vadd.f32 %v449_v40, %v412_v37  ;;  %v259_v53 = vmul.f32 %v1723_v33, %v1420_v6  ;;  %v260_v31 = vmul.f32 %v1728_v44, %v1420_v6  ;;  %v296_v5 = vmul.f32 %v1733_v52, %v1429_v11 }
  0x61   : > { %v722_v7 = vmax.f32 %v706_v8, 0.0  ;;  %v723_v54 = vmax.f32 %v707_v19, 0.0  ;;  %v517_v18 = vadd.f32 %v501_v0, %v464_v49  ;;  %v297_v21 = vmul.f32 %v1738_v57, %v1429_v11 }
  0x62   : > { %v518_v20 = vadd.f32 %v502_v59, %v465_v47  ;;  %v312_v12 = vadd.f32 %v296_v5, %v259_v53  ;;  %v349_v16 = vmul.f32 %v1743_v13, %v1443_v17  ;;  %v350_v33 = vmul.f32 %v1749_v39, %v1443_v17  ;;  %v1122_v47 = vld [vmem:[%s2008_s4] ss:$0 sm:$0xff] }
  0x63   : > { %v732_v58 = vpack.c.bf16 %v723_v54, %v722_v7  ;;  %v571_v6 = vadd.f32 %v555_v60, %v517_v18  ;;  %v313_v44 = vadd.f32 %v297_v21, %v260_v31  ;;  %v403_v52 = vmul.f32 %v1819_v14, %v1452_v22  ;;  %v1118_v60 = vld [vmem:[%s1410_s15 + $0xda] sm:$0xff] }
  0x64   : > { %v572_v23 = vadd.f32 %v556_v30, %v518_v20  ;;  %v365_v24 = vadd.f32 %v349_v16, %v312_v12  ;;  %v404_v11 = vmul.f32 %v1822_v61, %v1452_v22  ;;  %v456_v57 = vmul.f32 %v1827_v1, %v1462_v28 }
  0x65   : > { %1181 = vmatprep.mubr.bf16.mxu1 %v732_v58  ;;  %v624_v13 = vadd.f32 %v608_v3, %v571_v6  ;;  %v366_v17 = vadd.f32 %v350_v33, %v313_v44  ;;  %v457_v39 = vmul.f32 %v1830_v56, %v1462_v28  ;;  %v509_v15 = vmul.f32 %v1839_v42, %v1477_v34  ;;  %v1102_v28 = vld [vmem:[%s1410_s15 + $0xe1] sm:$0xff]  ;;  %s215_s15 = sand.u32 1, %s1305_s19  }
  0x66   : > { %v625_v10 = vadd.f32 %v609_v50, %v572_v23  ;;  %v419_v14 = vadd.f32 %v403_v52, %v365_v24  ;;  %v510_v1 = vmul.f32 %v1843_v46, %v1477_v34  ;;  %v563_v0 = vmul.f32 %v1498_v43, %v1084_v38  ;;  %s1014_s23 = sshll.u32 %s215_s15, 7  ;;  %s1963_s22 = scalar_lea.sflag [#allocation3], %s215_s15 }
  0x67   : > { %v677_v22 = vadd.f32 %v661_v35, %v624_v13  ;;  %v420_v61 = vadd.f32 %v404_v11, %v366_v17  ;;  %v564_v36 = vmul.f32 %v1498_v43, %v1085_v25  ;;  %v616_v27 = vmul.f32 %v1513_v48, %v1101_v26  ;;  %s1934_s25 = scalar_lea.vmem [#allocation2], %s1014_s23 }
  0x68   : > { %v678_v40 = vadd.f32 %v662_v62, %v625_v10  ;;  %v472_v9 = vadd.f32 %v456_v57, %v419_v14  ;;  %v617_v46 = vmul.f32 %v1513_v48, %v1102_v28  ;;  %v669_v32 = vmul.f32 %v1531_v55, %v1118_v60  ;;  %s948_s30 = sshll.u32 %s1934_s25, 4  ;;  %s1956_s30 = int_to_ptr.vmem [resolvable:$true] %s948_s30 }
  0x69   : > { %v700_v56 = vadd.f32 %v1619_v63, %v677_v22  ;;  %v473_v59 = vadd.f32 %v457_v39, %v420_v61  ;;  %v670_v43 = vmul.f32 %v1531_v55, %v1119_v2  ;;  %s1251_s9 = scalar_lea.vmem %s1956_s30, 2048  ;;  %p1258_p0 = scmp.lt.s32.totalorder %s1956_s30, %s1256_s11 }
  0x6a   : > { %v701_v42 = vadd.f32 %v1619_v63, %v678_v40  ;;  %v525_v45 = vadd.f32 %v509_v15, %v472_v9  ;;  %p1252_p11 = scmp.ne.s32.totalorder %s1956_s30, %s1251_s9  ;;  %p1259_p1 = scmp.lt.s32.totalorder %s1257_s12, %s1251_s9 }
  0x6b   : > { %v716_v41 = vmax.f32 %v700_v56, 0.0  ;;  %v526_v34 = vadd.f32 %v510_v1, %v473_v59 }
  0x6c   : > { %v717_v30 = vmax.f32 %v701_v42, 0.0  ;;  %v579_v37 = vadd.f32 %v563_v0, %v525_v45  ;;  %p1253_p12 = pnand %p1252_p11, %p1386_p5  ;;  %p1260_p2 = por %p1259_p1, %p1258_p0 }
  0x6d   : > { %v580_v3 = vadd.f32 %v564_v36, %v526_v34 }
  0x6e   : > { %v729_v29 = vpack.c.bf16 %v717_v30, %v716_v41  ;;  %v632_v50 = vadd.f32 %v616_v27, %v579_v37  ;;  %p1254_p13 = pneg %p1253_p12 }
  0x6f   : > { %v633_v4 = vadd.f32 %v617_v46, %v580_v3 }
  0x70   : > { %1174 = vmatmul.mubr.bf16.gmra.mrb[4].mxu0 %v729_v29  ;;  %v685_v35 = vadd.f32 %v669_v32, %v632_v50  ;;  %p1261_p3 = pnand %p1260_p2, %p1254_p13 }
  0x71   : > { %v686_v8 = vadd.f32 %v670_v43, %v633_v4 }
  0x72   : > { %v708_v19 = vadd.f32 %v1619_v63, %v685_v35 }
  0x73   : > { %v709_v49 = vadd.f32 %v1619_v63, %v686_v8 }
  0x74   : > { %v724_v48 = vmax.f32 %v708_v19, 0.0 }
  0x75   : > { %v725_v51 = vmax.f32 %v709_v49, 0.0 }
  0x77   : > { %v733_v62 = vpack.c.bf16 %v725_v51, %v724_v48 }
  0x79   : > { %1182 = vmatmul.mubr.bf16.gmra.mrb[4].mxu1 %v733_v62 }
 0x11b   : > { %v1171_v55 = vpop.f32.mrb[0].mxu0 }
 0x11c   : > { %v848_v53 = vadd.f32 %v1171_v55, %v1122_v47  ;;  %v839_v31 = vpop.f32.mrb[1].mxu0 }
 0x11d   : > { %v840_v5 = vadd.f32 %v1122_v47, %v839_v31  ;;  %v1172_v7 = vpop.f32.mrb[2].mxu0 }
 0x11e   : > { %v904_v54 = vmax.f32 %v848_v53, 0.0  ;;  %v851_v18 = vadd.f32 %v1172_v7, %v1122_v47  ;;  %v842_v21 = vpop.f32.mrb[3].mxu0 }
 0x11f   : > { %v902_v63 = vmax.f32 %v840_v5, 0.0  ;;  %v843_v20 = vadd.f32 %v1122_v47, %v842_v21 }
 0x120   : > { %920 = vst [vmem:[%s1934_s25 + $0x10] sm:$0xff] %v904_v54  ;;  %v905_v12 = vmax.f32 %v851_v18, 0.0 }
 0x121   : > { %918 = vst [vmem:[%s1934_s25] sm:$0xff] %v902_v63  ;;  %v903_v16 = vmax.f32 %v843_v20, 0.0 }
 0x122   : > { %921 = vst [vmem:[%s1934_s25 + $0x18] sm:$0xff] %v905_v12 }
 0x123   : > { %919 = vst [vmem:[%s1934_s25 + $0x8] sm:$0xff] %v903_v16 }
 0x126   : > { %v1179_v33 = vpop.f32.mrb[0].mxu1 }
 0x127   : > { %v880_v58 = vadd.f32 %v1179_v33, %v1122_v47  ;;  %v871_v6 = vpop.f32.mrb[1].mxu1 }
 0x128   : > { %v872_v44 = vadd.f32 %v1122_v47, %v871_v6  ;;  %v1180_v52 = vpop.f32.mrb[2].mxu1 }
 0x129   : > { %v912_v23 = vmax.f32 %v880_v58, 0.0  ;;  %v883_v24 = vadd.f32 %v1180_v52, %v1122_v47  ;;  %v874_v11 = vpop.f32.mrb[3].mxu1 }
 0x12a   : > { %v910_v57 = vmax.f32 %v872_v44, 0.0  ;;  %v875_v13 = vadd.f32 %v1122_v47, %v874_v11 }
 0x12b   : > { %928 = vst [vmem:[%s1934_s25 + $0x50] sm:$0xff] %v912_v23  ;;  %v913_v17 = vmax.f32 %v883_v24, 0.0 }
 0x12c   : > { %926 = vst [vmem:[%s1934_s25 + $0x40] sm:$0xff] %v910_v57  ;;  %v911_v39 = vmax.f32 %v875_v13, 0.0 }
 0x12d   : > { %929 = vst [vmem:[%s1934_s25 + $0x58] sm:$0xff] %v913_v17 }
 0x12e   : > { %927 = vst [vmem:[%s1934_s25 + $0x48] sm:$0xff] %v911_v39 }
 0x143   : > { %v1175_v38 = vpop.f32.mrb[4].mxu0 }
 0x144   : > { %v864_v10 = vadd.f32 %v1175_v38, %v1122_v47  ;;  %v855_v14 = vpop.f32.mrb[5].mxu0 }
 0x145   : > { %v856_v15 = vadd.f32 %v1122_v47, %v855_v14  ;;  %v1176_v25 = vpop.f32.mrb[6].mxu0 }
 0x146   : > { %v908_v22 = vmax.f32 %v864_v10, 0.0  ;;  %v867_v61 = vadd.f32 %v1176_v25, %v1122_v47  ;;  %v858_v1 = vpop.f32.mrb[7].mxu0 }
 0x147   : > { %v906_v26 = vmax.f32 %v856_v15, 0.0  ;;  %v859_v40 = vadd.f32 %v1122_v47, %v858_v1 }
 0x148   : > { %924 = vst [vmem:[%s1934_s25 + $0x30] sm:$0xff] %v908_v22  ;;  %v909_v9 = vmax.f32 %v867_v61, 0.0 }
 0x149   : > { %922 = vst [vmem:[%s1934_s25 + $0x20] sm:$0xff] %v906_v26  ;;  %v907_v0 = vmax.f32 %v859_v40, 0.0 }
 0x14a   : > { %925 = vst [vmem:[%s1934_s25 + $0x38] sm:$0xff] %v909_v9 }
 0x14b   : > { %923 = vst [vmem:[%s1934_s25 + $0x28] sm:$0xff] %v907_v0 }
 0x14c   : > { %v1183_v28 = vpop.f32.mrb[4].mxu1 }
 0x14d   : > { %v896_v56 = vadd.f32 %v1183_v28, %v1122_v47  ;;  %v887_v59 = vpop.f32.mrb[5].mxu1 }
 0x14e   : > { %v888_v36 = vadd.f32 %v1122_v47, %v887_v59  ;;  %v1184_v60 = vpop.f32.mrb[6].mxu1 }
 0x14f   : > { %v916_v42 = vmax.f32 %v896_v56, 0.0  ;;  %v899_v45 = vadd.f32 %v1184_v60, %v1122_v47  ;;  %v890_v27 = vpop.f32.mrb[7].mxu1 }
 0x150   : > { %v914_v2 = vmax.f32 %v888_v36, 0.0  ;;  %v891_v41 = vadd.f32 %v1122_v47, %v890_v27 }
 0x151   : > { %932 = vst [vmem:[%s1934_s25 + $0x70] sm:$0xff] %v916_v42  ;;  %v917_v34 = vmax.f32 %v899_v45, 0.0 }
 0x152   : > { %930 = vst [vmem:[%s1934_s25 + $0x60] sm:$0xff] %v914_v2  ;;  %v915_v46 = vmax.f32 %v891_v41, 0.0 }
 0x153   : > { %933 = vst [vmem:[%s1934_s25 + $0x78] sm:$0xff] %v917_v34 }
 0x154   : > { %931 = vst [vmem:[%s1934_s25 + $0x68] sm:$0xff] %v915_v46 }
 0x155   : > { %1264 = shalt.err (!%p1261_p3)
}
 0x156   : > { %s1265_s13 = scalar_lea.hbm %s1954_s8, 2048  ;;  %s1269_s16 = scalar_lea.hbm %s2009_s5, 8192 }
 0x157   : > { %p1266_p4 = scmp.ne.s32.totalorder %s1954_s8, %s1265_s13  ;;  %p1270_p9 = scmp.lt.u32.totalorder %s1954_s8, %s2009_s5 }
 0x158   : > { %p1271_p10 = scmp.lt.u32.totalorder %s1269_s16, %s1265_s13  ;;  %p1273_p12 = scmp.lt.u32.totalorder %s1265_s13, %s1954_s8 }
 0x159   : > { %p1267_p7 = pnand %p1266_p4, %p1386_p5 }
 0x15a   : > { %p1272_p11 = por %p1271_p10, %p1270_p9 }
 0x15b   : > { %p1268_p8 = pneg %p1267_p7 }
 0x15c   : > { %p1274_p13 = por %p1273_p12, %p1272_p11 }
 0x15e   : > { %p1275_p0 = pnand %p1274_p13, %p1268_p8 }
 0x160   : > { %1278 = shalt.err (!%p1275_p0)
}
 0x161   : > { %s1316_s25 = smov 128   ;;  %s1317_s26 = smov 8  }
 0x162   : > { %1202 = dma.vmem_to_hbm [thread:$0]  (%p1386_p5), %s1956_s30, 2048, %s1954_s8, %s1963_s22, %s1316_s25, %s1316_s25, %s1317_s26  }
 0x163 PF: > { %p1208_p1 = scmp.ge.s32.totalorder %s1313_s21, 2  ;;  %s963_s6 = sand.u32 1, %s1301_s18  }
 0x164   : > { %s964_s7 = scalar_lea.sflag [#allocation3], %s963_s6 }
 0x165   : > { %p1205_p2 = pnand %p1208_p1, %p1390_p6 }
 0x167   : > { %1296 = dma.done.wait (!%p1205_p2), %s964_s7, 2048  }
 0x168   : > { %1298 = vsyncadd (!%p1205_p2), %s964_s7, 4294965248  ;;  %p15_p3 = scmp.ge.s32.totalorder %s1373_s24, 6   ;;  %s2030_s18 = smov %s1305_s19 }
 0x169   : > { %s2031_s19 = smov %s1309_s20  ;;  %s2032_s20 = smov %s1384_s27 }
 0x16a   : > { %s2033_s21 = smov %s1373_s24  ;;  %17 = sbr.rel (!%p15_p3) target bundleno = 3 (0x3), region = 77 }
 0x171   :  { %969 = vsyncpa [#allocation3], 1 }
 0x172   :  { %971 = vsyncpa [#allocation3 + $0x1], 1 }

</bundles_post_ra>
